<compile_context>
chip_gen: v5e
topology: v5e:2x2
jax: 0.10.0
libtpu: 0.0.40
codegen_flags: <defaults>
</compile_context>

<pallas_src>
from functools import partial

import jax
import jax.numpy as jnp
from jax.experimental import pallas as pl
from jax.experimental.pallas import tpu as pltpu


# ------------------------------ Pallas kernel ------------------------------ #

def _vqvae_encoder_kernel(x_ref, w1_ref, b1_ref, w2_ref, b2_ref, cbt_ref,
                          e2_ref, ze_ref, idx_ref,
                          im1_ref, h_ref, im2_ref, *, seq_len):
    f32 = jnp.float32
    RL, Cin = x_ref.shape                  # RL = TB * L rows of input (chan-last)
    H = w1_ref.shape[1]                    # hidden_dim
    Kemb = e2_ref.shape[1]                 # num_embeddings
    L = seq_len
    L1, L2 = L // 2, L // 4
    TB = RL // L                           # samples in this block
    R1, R2 = TB * L1, TB * L2              # conv1 / conv2 output rows

    # ---------------- conv1 (k=4, stride=2, pad=1) + ReLU -------------------
    # im2col row r (= b*L1 + i) holds [x[2i-1], x[2i], x[2i+1], x[2i+2]] with
    # channels flattened and zero padding at the per-sample edges.  Taps are
    # plain stride-2 sublane reads; the shifted taps (k=0,3) are stored one
    # row off and masked where the shift crosses a sample boundary.
    im1_ref[...] = jnp.zeros(im1_ref.shape, f32)
    im1_ref[:, Cin:2 * Cin] = x_ref[pl.ds(0, R1, stride=2), :]        # x[2i]
    im1_ref[:, 2 * Cin:3 * Cin] = x_ref[pl.ds(1, R1, stride=2), :]    # x[2i+1]
    edge1 = (jax.lax.broadcasted_iota(jnp.int32, (R1 - 1, 1), 0) % L1) == (L1 - 1)
    t0 = x_ref[pl.ds(1, R1 - 1, stride=2), :]                         # x[2i-1], i>=1
    im1_ref[pl.ds(1, R1 - 1), 0:Cin] = jnp.where(edge1, 0.0, t0)
    t3 = x_ref[pl.ds(2, R1 - 1, stride=2), :]                         # x[2i+2], i<L1-1
    im1_ref[pl.ds(0, R1 - 1), 3 * Cin:4 * Cin] = jnp.where(edge1, 0.0, t3)

    h = jnp.dot(im1_ref[...], w1_ref[...], preferred_element_type=f32,
                precision=jax.lax.Precision.HIGHEST) + b1_ref[...]
    h_ref[...] = jnp.maximum(h, 0.0)                                   # (R1, H)

    # ---------------- conv2 (k=4, stride=2, pad=1) ---------------------------
    im2_ref[...] = jnp.zeros(im2_ref.shape, f32)
    im2_ref[:, H:2 * H] = h_ref[pl.ds(0, R2, stride=2), :]
    im2_ref[:, 2 * H:3 * H] = h_ref[pl.ds(1, R2, stride=2), :]
    edge2 = (jax.lax.broadcasted_iota(jnp.int32, (R2 - 1, 1), 0) % L2) == (L2 - 1)
    u0 = h_ref[pl.ds(1, R2 - 1, stride=2), :]
    im2_ref[pl.ds(1, R2 - 1), 0:H] = jnp.where(edge2, 0.0, u0)
    u3 = h_ref[pl.ds(2, R2 - 1, stride=2), :]
    im2_ref[pl.ds(0, R2 - 1), 3 * H:4 * H] = jnp.where(edge2, 0.0, u3)

    z = jnp.dot(im2_ref[...], w2_ref[...], preferred_element_type=f32,
                precision=jax.lax.Precision.HIGHEST) + b2_ref[...]     # (R2, D)

    # ---------------- vector quantization ------------------------------------
    # argmin_j |z - e_j|^2 == argmin_j (|e_j|^2 - 2 z.e_j); |z|^2 dropped
    # (constant per row, argmin/tie-break unchanged).
    ze = jnp.dot(z, cbt_ref[...], preferred_element_type=f32,
                 precision=jax.lax.Precision.HIGHEST)                  # (R2, Kemb)
    d2 = e2_ref[...] - 2.0 * ze
    dmin = jnp.min(d2, axis=1, keepdims=True)
    lane = jax.lax.broadcasted_iota(jnp.int32, (R2, Kemb), 1)
    # first-occurrence argmin (matches torch.argmin tie-breaking)
    idx = jnp.min(jnp.where(d2 <= dmin, lane, Kemb), axis=1, keepdims=True)

    ze_ref[...] = z.astype(ze_ref.dtype)                               # (R2, D)
    idx_ref[...] = idx.astype(jnp.int32)                               # (R2, 1)


# ------------------------------- JAX wrapper -------------------------------- #

def _pick_block_batch(B, L):
    """Samples per grid step: fill the matmul M-dim (>=8 rows, <=~512 rows)
    while keeping every non-final block (8, *)-aligned on the sublane axis."""
    L2 = L // 4
    best = 1
    for tb in range(1, B + 1):
        if B % tb != 0:
            continue
        if tb * L2 > 512:
            break
        if tb != B and (tb * L2) % 8 != 0:
            continue
        best = tb
    return best


@jax.jit
def vqvae_encoder_forward(params, x):
    """x: (B, input_dim, L) float32, NCL layout like PyTorch."""
    w1, b1 = params["w1"], params["b1"]            # (H, Cin, K=4), (H,)
    w2, b2 = params["w2"], params["b2"]            # (D, H, K=4), (D,)
    cb = params["codebook"]                        # (Kemb, D)

    B, Cin, L = x.shape
    H, _, K = w1.shape
    D = w2.shape[0]
    Kemb = cb.shape[0]
    assert K == 4 and w2.shape[2] == 4, "module uses kernel_size=4"
    assert L % 4 == 0, "two stride-2 convs assume L divisible by 4"
    L2 = L // 4

    TB = _pick_block_batch(B, L)
    grid = (B // TB,)

    # Channels-last rows for the conv matmuls; tap-major flattened weights so
    # each conv is ONE (rows, K*C) @ (K*C, O) matmul; codebook pre-transposed
    # and |e|^2 precomputed so the kernel needs no in-kernel transposes.
    x_rows = jnp.transpose(x, (0, 2, 1)).reshape(B * L, Cin)
    w1f = jnp.transpose(w1, (2, 1, 0)).reshape(K * Cin, H)   # (K*Cin, H)
    w2f = jnp.transpose(w2, (2, 1, 0)).reshape(K * H, D)     # (K*H, D) = (128, D)
    b1r = b1[None, :]                                        # (1, H)
    b2r = b2[None, :]                                        # (1, D)
    cbt = jnp.transpose(cb)                                  # (D, Kemb)
    e2 = jnp.sum(cb * cb, axis=1)[None, :]                   # (1, Kemb)

    kernel = partial(_vqvae_encoder_kernel, seq_len=L)
    ze_rows, idx = pl.pallas_call(
        kernel,
        grid=grid,
        in_specs=[
            pl.BlockSpec((TB * L, Cin), lambda g: (g, 0)),   # streamed input rows
            pl.BlockSpec((K * Cin, H), lambda g: (0, 0)),    # resident conv1 weight
            pl.BlockSpec((1, H), lambda g: (0, 0)),          # resident conv1 bias
            pl.BlockSpec((K * H, D), lambda g: (0, 0)),      # resident conv2 weight
            pl.BlockSpec((1, D), lambda g: (0, 0)),          # resident conv2 bias
            pl.BlockSpec((D, Kemb), lambda g: (0, 0)),       # resident codebook^T
            pl.BlockSpec((1, Kemb), lambda g: (0, 0)),       # resident |e_j|^2
        ],
        out_specs=(
            pl.BlockSpec((TB * L2, D), lambda g: (g, 0)),    # z_e rows (chan-last)
            pl.BlockSpec((TB * L2, 1), lambda g: (g, 0)),    # encoding indices
        ),
        out_shape=(
            jax.ShapeDtypeStruct((B * L2, D), jnp.float32),
            jax.ShapeDtypeStruct((B * L2, 1), jnp.int32),
        ),
        scratch_shapes=[
            pltpu.VMEM((TB * L // 2, K * Cin), jnp.float32),  # conv1 im2col
            pltpu.VMEM((TB * L // 2, H), jnp.float32),        # relu(conv1) rows
            pltpu.VMEM((TB * L2, K * H), jnp.float32),        # conv2 im2col
        ],
        compiler_params=pltpu.CompilerParams(
            dimension_semantics=("parallel",)),
    )(x_rows, w1f, b1r, w2f, b2r, cbt, e2)

    encoding_indices = idx.reshape(B * L2)                    # int32 (torch: int64)
    z_e = jnp.transpose(ze_rows.reshape(B, L2, D), (0, 2, 1))  # (B, D, L2) NCL
    # PyTorch does a *raw* `.view(z_e.shape)` on the gathered (B*L2, D) rows;
    # replicate exactly (gather done outside the kernel).
    z_q = cb[encoding_indices].reshape(z_e.shape)
    return z_q, encoding_indices, z_e


# ------------------------------ init / reference ---------------------------- #

def init_params(key, input_dim, hidden_dim, num_embeddings, embedding_dim):
    k1, k2, k3, k4, k5 = jax.random.split(key, 5)
    kern = 4
    s1 = 1.0 / (input_dim * kern) ** 0.5           # PyTorch default Conv1d bound
    w1 = jax.random.uniform(k1, (hidden_dim, input_dim, kern), jnp.float32, -s1, s1)
    b1 = jax.random.uniform(k2, (hidden_dim,), jnp.float32, -s1, s1)
    s2 = 1.0 / (hidden_dim * kern) ** 0.5
    w2 = jax.random.uniform(k3, (embedding_dim, hidden_dim, kern), jnp.float32, -s2, s2)
    b2 = jax.random.uniform(k4, (embedding_dim,), jnp.float32, -s2, s2)
    codebook = jax.random.normal(k5, (num_embeddings, embedding_dim), jnp.float32)
    return dict(w1=w1, b1=b1, w2=w2, b2=b2, codebook=codebook)


def reference_forward(params, x):
    """Pure-JAX fp32 reference."""
    dn1 = jax.lax.conv_dimension_numbers(x.shape, params["w1"].shape, ('NCH', 'OIH', 'NCH'))
    h = jax.lax.conv_general_dilated(x, params["w1"], (2,), [(1, 1)],
                                     dimension_numbers=dn1,
                                     precision=jax.lax.Precision.HIGHEST)
    h = jax.nn.relu(h + params["b1"][None, :, None])
    dn2 = jax.lax.conv_dimension_numbers(h.shape, params["w2"].shape, ('NCH', 'OIH', 'NCH'))
    z_e = jax.lax.conv_general_dilated(h, params["w2"], (2,), [(1, 1)],
                                       dimension_numbers=dn2,
                                       precision=jax.lax.Precision.HIGHEST)
    z_e = z_e + params["b2"][None, :, None]
    d = z_e.shape[1]
    z_flat = jnp.transpose(z_e, (0, 2, 1)).reshape(-1, d)
    diff = z_flat[:, None, :] - params["codebook"][None, :, :]
    dist = jnp.sqrt(jnp.sum(diff * diff, axis=-1))
    idx = jnp.argmin(dist, axis=1).astype(jnp.int32)
    z_q = params["codebook"][idx].reshape(z_e.shape)
    return z_q, idx, z_e


# ----------------------------------- main ----------------------------------- #

if __name__ == "__main__":
    key = jax.random.PRNGKey(0)
    B, Cin, L = 2, 4, 16
    hidden_dim, num_embeddings, embedding_dim = 32, 64, 16

    kp, kx = jax.random.split(key)
    params = init_params(kp, Cin, hidden_dim, num_embeddings, embedding_dim)
    x = jax.random.normal(kx, (B, Cin, L), jnp.float32)

    z_q, enc_idx, z_e = jax.block_until_ready(vqvae_encoder_forward(params, x))

    L2 = L // 4
    assert z_q.shape == (B, embedding_dim, L2)
    assert enc_idx.shape == (B * L2,)
    assert z_e.shape == (B, embedding_dim, L2)

    # Conv path: kernel runs HIGHEST-precision matmuls, so it should match the
    # fp32 reference tightly.
    _, _, z_e_ref = reference_forward(params, x)
    assert jnp.allclose(z_e, z_e_ref, atol=1e-4, rtol=1e-4), (
        float(jnp.max(jnp.abs(z_e - z_e_ref))))

    # VQ stage: indices must equal the exact nearest neighbour computed from
    # the kernel's own z_e.
    cb = params["codebook"]
    zf = jnp.transpose(z_e, (0, 2, 1)).reshape(-1, embedding_dim)
    dist = jnp.sqrt(jnp.sum((zf[:, None, :] - cb[None, :, :]) ** 2, axis=-1))
    idx_exact = jnp.argmin(dist, axis=1).astype(jnp.int32)
    assert bool(jnp.all(enc_idx == idx_exact))

    # z_q must be the raw `.view(z_e.shape)` of the gathered codebook rows.
    assert jnp.allclose(z_q, cb[idx_exact].reshape(z_e.shape))

    print("KERNEL_OK")
</pallas_src>

<mosaic_0001>
module attributes {stable_mosaic.version = 11 : i64} {
  func.func @_vqvae_encoder_kernel(%arg0: i32, %arg1: memref<32x4xf32, #tpu.memory_space<vmem>>, %arg2: memref<16x32xf32, #tpu.memory_space<vmem>>, %arg3: memref<1x32xf32, #tpu.memory_space<vmem>>, %arg4: memref<128x16xf32, #tpu.memory_space<vmem>>, %arg5: memref<1x16xf32, #tpu.memory_space<vmem>>, %arg6: memref<16x64xf32, #tpu.memory_space<vmem>>, %arg7: memref<1x64xf32, #tpu.memory_space<vmem>>, %arg8: memref<8x16xf32, #tpu.memory_space<vmem>>, %arg9: memref<8x1xi32, #tpu.memory_space<vmem>>, %arg10: memref<16x16xf32, #tpu.memory_space<vmem>>, %arg11: memref<16x32xf32, #tpu.memory_space<vmem>>, %arg12: memref<8x128xf32, #tpu.memory_space<vmem>>) attributes {dimension_semantics = [#tpu.dimension_semantics<parallel>], iteration_bounds = array<i64: 1>, scalar_prefetch = 0 : i64, scratch_operands = 3 : i64, tpu.core_type = #tpu.core_type<tc>, window_params = [{transform_indices = @transform_0, window_bounds = array<i64: 32, 4>}, {pipeline_mode = #tpu.pipeline_mode<synchronous>, transform_indices = @transform_1, window_bounds = array<i64: 16, 32>}, {pipeline_mode = #tpu.pipeline_mode<synchronous>, transform_indices = @transform_2, window_bounds = array<i64: 1, 32>}, {pipeline_mode = #tpu.pipeline_mode<synchronous>, transform_indices = @transform_3, window_bounds = array<i64: 128, 16>}, {pipeline_mode = #tpu.pipeline_mode<synchronous>, transform_indices = @transform_4, window_bounds = array<i64: 1, 16>}, {pipeline_mode = #tpu.pipeline_mode<synchronous>, transform_indices = @transform_5, window_bounds = array<i64: 16, 64>}, {pipeline_mode = #tpu.pipeline_mode<synchronous>, transform_indices = @transform_6, window_bounds = array<i64: 1, 64>}, {transform_indices = @transform_7, window_bounds = array<i64: 8, 16>}, {transform_indices = @transform_8, window_bounds = array<i64: 8, 1>}]} {
    %cst = arith.constant 0.000000e+00 : f32
    %0 = vector.broadcast %cst : f32 to vector<16x16xf32>
    %c0 = arith.constant 0 : index
    %c0_0 = arith.constant 0 : index
    %1 = vector.load %arg10[%c0, %c0_0] : memref<16x16xf32, #tpu.memory_space<vmem>>, vector<16x16xf32>
    tpu.vector_store %arg10[%c0, %c0_0], %0 {strides = array<i32>} : memref<16x16xf32, #tpu.memory_space<vmem>>, vector<16x16xf32>,
    %c0_1 = arith.constant 0 : index
    %c0_2 = arith.constant 0 : index
    %2 = tpu.strided_load %arg1[%c0_1, %c0_2] {strides = array<i32: 2, 1>} : memref<32x4xf32, #tpu.memory_space<vmem>>, vector<16x4xf32>
    %c0_3 = arith.constant 0 : index
    %c4 = arith.constant 4 : index
    %3 = vector.load %arg10[%c0_3, %c4] : memref<16x16xf32, #tpu.memory_space<vmem>>, vector<16x4xf32>
    tpu.vector_store %arg10[%c0_3, %c4], %2 {strides = array<i32>} : memref<16x16xf32, #tpu.memory_space<vmem>>, vector<16x4xf32>,
    %c1 = arith.constant 1 : index
    %c0_4 = arith.constant 0 : index
    %4 = tpu.strided_load %arg1[%c1, %c0_4] {strides = array<i32: 2, 1>} : memref<32x4xf32, #tpu.memory_space<vmem>>, vector<16x4xf32>
    %c0_5 = arith.constant 0 : index
    %c8 = arith.constant 8 : index
    %5 = vector.load %arg10[%c0_5, %c8] : memref<16x16xf32, #tpu.memory_space<vmem>>, vector<16x4xf32>
    tpu.vector_store %arg10[%c0_5, %c8], %4 {strides = array<i32>} : memref<16x16xf32, #tpu.memory_space<vmem>>, vector<16x4xf32>,
    %6 = tpu.iota {dimensions = array<i32: 0>} : vector<15x1xi32>
    %c8_i32 = arith.constant 8 : i32
    %c0_i32 = arith.constant 0 : i32
    %7 = arith.cmpi eq, %c8_i32, %c0_i32 : i32
    %c1_i32 = arith.constant 1 : i32
    %8 = arith.select %7, %c1_i32, %c8_i32 : i32
    %9 = vector.broadcast %8 : i32 to vector<15x1xi32>
    %10 = arith.remsi %6, %9 : vector<15x1xi32>
    %c0_i32_6 = arith.constant 0 : i32
    %11 = vector.broadcast %c0_i32_6 : i32 to vector<15x1xi32>
    %12 = arith.cmpi ne, %10, %11 : vector<15x1xi32>
    %c0_i32_7 = arith.constant 0 : i32
    %13 = vector.broadcast %c0_i32_7 : i32 to vector<15x1xi32>
    %14 = arith.cmpi slt, %10, %13 : vector<15x1xi32>
    %c0_i32_8 = arith.constant 0 : i32
    %15 = arith.cmpi slt, %8, %c0_i32_8 : i32
    %16 = vector.broadcast %15 : i1 to vector<15x1xi1>
    %17 = vector.broadcast %16 : vector<15x1xi1> to vector<15x1xi1>
    %18 = arith.xori %14, %17 : vector<15x1xi1>
    %19 = arith.andi %18, %12 : vector<15x1xi1>
    %20 = vector.broadcast %8 : i32 to vector<15x1xi32>
    %21 = arith.addi %10, %20 : vector<15x1xi32>
    %22 = arith.select %19, %21, %10 : vector<15x1xi1>, vector<15x1xi32>
    %c7_i32 = arith.constant 7 : i32
    %23 = vector.broadcast %c7_i32 : i32 to vector<15x1xi32>
    %24 = arith.cmpi eq, %22, %23 : vector<15x1xi32>
    %c1_9 = arith.constant 1 : index
    %c0_10 = arith.constant 0 : index
    %25 = tpu.strided_load %arg1[%c1_9, %c0_10] {strides = array<i32: 2, 1>} : memref<32x4xf32, #tpu.memory_space<vmem>>, vector<15x4xf32>
    %cst_11 = arith.constant 0.000000e+00 : f32
    %26 = vector.shape_cast %24 : vector<15x1xi1> to vector<15x1xi1>
    %27 = vector.broadcast %26 : vector<15x1xi1> to vector<15x4xi1>
    %28 = vector.broadcast %cst_11 : f32 to vector<15x4xf32>
    %29 = arith.select %27, %28, %25 : vector<15x4xi1>, vector<15x4xf32>
    %c1_12 = arith.constant 1 : index
    %c0_13 = arith.constant 0 : index
    %30 = vector.load %arg10[%c1_12, %c0_13] : memref<16x16xf32, #tpu.memory_space<vmem>>, vector<15x4xf32>
    tpu.vector_store %arg10[%c1_12, %c0_13], %29 {strides = array<i32>} : memref<16x16xf32, #tpu.memory_space<vmem>>, vector<15x4xf32>,
    %c2 = arith.constant 2 : index
    %c0_14 = arith.constant 0 : index
    %31 = tpu.strided_load %arg1[%c2, %c0_14] {strides = array<i32: 2, 1>} : memref<32x4xf32, #tpu.memory_space<vmem>>, vector<15x4xf32>
    %cst_15 = arith.constant 0.000000e+00 : f32
    %32 = vector.shape_cast %24 : vector<15x1xi1> to vector<15x1xi1>
    %33 = vector.broadcast %32 : vector<15x1xi1> to vector<15x4xi1>
    %34 = vector.broadcast %cst_15 : f32 to vector<15x4xf32>
    %35 = arith.select %33, %34, %31 : vector<15x4xi1>, vector<15x4xf32>
    %c0_16 = arith.constant 0 : index
    %c12 = arith.constant 12 : index
    %36 = vector.load %arg10[%c0_16, %c12] : memref<16x16xf32, #tpu.memory_space<vmem>>, vector<15x4xf32>
    tpu.vector_store %arg10[%c0_16, %c12], %35 {strides = array<i32>} : memref<16x16xf32, #tpu.memory_space<vmem>>, vector<15x4xf32>,
    %c0_17 = arith.constant 0 : index
    %c0_18 = arith.constant 0 : index
    %37 = vector.load %arg10[%c0_17, %c0_18] : memref<16x16xf32, #tpu.memory_space<vmem>>, vector<16x16xf32>
    %c0_19 = arith.constant 0 : index
    %c0_20 = arith.constant 0 : index
    %38 = vector.load %arg2[%c0_19, %c0_20] : memref<16x32xf32, #tpu.memory_space<vmem>>, vector<16x32xf32>
    %cst_21 = arith.constant dense<0.000000e+00> : vector<16x32xf32>
    %39 = tpu.matmul %37, %38, %cst_21 {dimension_numbers = #tpu.dot_dimension_numbers<[1], [0], [0], [1], [0, 0, 1, 1], [], []>, precision = #tpu.contract_precision<fp32>} : vector<16x16xf32>, vector<16x32xf32>, vector<16x32xf32> -> vector<16x32xf32>
    %c0_22 = arith.constant 0 : index
    %c0_23 = arith.constant 0 : index
    %40 = vector.load %arg3[%c0_22, %c0_23] : memref<1x32xf32, #tpu.memory_space<vmem>>, vector<1x32xf32>
    %41 = vector.broadcast %40 : vector<1x32xf32> to vector<16x32xf32>
    %42 = arith.addf %39, %41 : vector<16x32xf32>
    %cst_24 = arith.constant 0.000000e+00 : f32
    %43 = vector.broadcast %cst_24 : f32 to vector<16x32xf32>
    %44 = arith.maximumf %42, %43 : vector<16x32xf32>
    %c0_25 = arith.constant 0 : index
    %c0_26 = arith.constant 0 : index
    %45 = vector.load %arg11[%c0_25, %c0_26] : memref<16x32xf32, #tpu.memory_space<vmem>>, vector<16x32xf32>
    tpu.vector_store %arg11[%c0_25, %c0_26], %44 {strides = array<i32>} : memref<16x32xf32, #tpu.memory_space<vmem>>, vector<16x32xf32>,
    %cst_27 = arith.constant 0.000000e+00 : f32
    %46 = vector.broadcast %cst_27 : f32 to vector<8x128xf32>
    %c0_28 = arith.constant 0 : index
    %c0_29 = arith.constant 0 : index
    %47 = vector.load %arg12[%c0_28, %c0_29] : memref<8x128xf32, #tpu.memory_space<vmem>>, vector<8x128xf32>
    tpu.vector_store %arg12[%c0_28, %c0_29], %46 {strides = array<i32>} : memref<8x128xf32, #tpu.memory_space<vmem>>, vector<8x128xf32>,
    %c0_30 = arith.constant 0 : index
    %c0_31 = arith.constant 0 : index
    %48 = tpu.strided_load %arg11[%c0_30, %c0_31] {strides = array<i32: 2, 1>} : memref<16x32xf32, #tpu.memory_space<vmem>>, vector<8x32xf32>
    %c0_32 = arith.constant 0 : index
    %c32 = arith.constant 32 : index
    %49 = vector.load %arg12[%c0_32, %c32] : memref<8x128xf32, #tpu.memory_space<vmem>>, vector<8x32xf32>
    tpu.vector_store %arg12[%c0_32, %c32], %48 {strides = array<i32>} : memref<8x128xf32, #tpu.memory_space<vmem>>, vector<8x32xf32>,
    %c1_33 = arith.constant 1 : index
    %c0_34 = arith.constant 0 : index
    %50 = tpu.strided_load %arg11[%c1_33, %c0_34] {strides = array<i32: 2, 1>} : memref<16x32xf32, #tpu.memory_space<vmem>>, vector<8x32xf32>
    %c0_35 = arith.constant 0 : index
    %c64 = arith.constant 64 : index
    %51 = vector.load %arg12[%c0_35, %c64] : memref<8x128xf32, #tpu.memory_space<vmem>>, vector<8x32xf32>
    tpu.vector_store %arg12[%c0_35, %c64], %50 {strides = array<i32>} : memref<8x128xf32, #tpu.memory_space<vmem>>, vector<8x32xf32>,
    %52 = tpu.iota {dimensions = array<i32: 0>} : vector<7x1xi32>
    %c4_i32 = arith.constant 4 : i32
    %c0_i32_36 = arith.constant 0 : i32
    %53 = arith.cmpi eq, %c4_i32, %c0_i32_36 : i32
    %c1_i32_37 = arith.constant 1 : i32
    %54 = arith.select %53, %c1_i32_37, %c4_i32 : i32
    %55 = vector.broadcast %54 : i32 to vector<7x1xi32>
    %56 = arith.remsi %52, %55 : vector<7x1xi32>
    %c0_i32_38 = arith.constant 0 : i32
    %57 = vector.broadcast %c0_i32_38 : i32 to vector<7x1xi32>
    %58 = arith.cmpi ne, %56, %57 : vector<7x1xi32>
    %c0_i32_39 = arith.constant 0 : i32
    %59 = vector.broadcast %c0_i32_39 : i32 to vector<7x1xi32>
    %60 = arith.cmpi slt, %56, %59 : vector<7x1xi32>
    %c0_i32_40 = arith.constant 0 : i32
    %61 = arith.cmpi slt, %54, %c0_i32_40 : i32
    %62 = vector.broadcast %61 : i1 to vector<7x1xi1>
    %63 = vector.broadcast %62 : vector<7x1xi1> to vector<7x1xi1>
    %64 = arith.xori %60, %63 : vector<7x1xi1>
    %65 = arith.andi %64, %58 : vector<7x1xi1>
    %66 = vector.broadcast %54 : i32 to vector<7x1xi32>
    %67 = arith.addi %56, %66 : vector<7x1xi32>
    %68 = arith.select %65, %67, %56 : vector<7x1xi1>, vector<7x1xi32>
    %c3_i32 = arith.constant 3 : i32
    %69 = vector.broadcast %c3_i32 : i32 to vector<7x1xi32>
    %70 = arith.cmpi eq, %68, %69 : vector<7x1xi32>
    %c1_41 = arith.constant 1 : index
    %c0_42 = arith.constant 0 : index
    %71 = tpu.strided_load %arg11[%c1_41, %c0_42] {strides = array<i32: 2, 1>} : memref<16x32xf32, #tpu.memory_space<vmem>>, vector<7x32xf32>
    %cst_43 = arith.constant 0.000000e+00 : f32
    %72 = vector.shape_cast %70 : vector<7x1xi1> to vector<7x1xi1>
    %73 = vector.broadcast %72 : vector<7x1xi1> to vector<7x32xi1>
    %74 = vector.broadcast %cst_43 : f32 to vector<7x32xf32>
    %75 = arith.select %73, %74, %71 : vector<7x32xi1>, vector<7x32xf32>
    %c1_44 = arith.constant 1 : index
    %c0_45 = arith.constant 0 : index
    %76 = vector.load %arg12[%c1_44, %c0_45] : memref<8x128xf32, #tpu.memory_space<vmem>>, vector<7x32xf32>
    tpu.vector_store %arg12[%c1_44, %c0_45], %75 {strides = array<i32>} : memref<8x128xf32, #tpu.memory_space<vmem>>, vector<7x32xf32>,
    %c2_46 = arith.constant 2 : index
    %c0_47 = arith.constant 0 : index
    %77 = tpu.strided_load %arg11[%c2_46, %c0_47] {strides = array<i32: 2, 1>} : memref<16x32xf32, #tpu.memory_space<vmem>>, vector<7x32xf32>
    %cst_48 = arith.constant 0.000000e+00 : f32
    %78 = vector.shape_cast %70 : vector<7x1xi1> to vector<7x1xi1>
    %79 = vector.broadcast %78 : vector<7x1xi1> to vector<7x32xi1>
    %80 = vector.broadcast %cst_48 : f32 to vector<7x32xf32>
    %81 = arith.select %79, %80, %77 : vector<7x32xi1>, vector<7x32xf32>
    %c0_49 = arith.constant 0 : index
    %c96 = arith.constant 96 : index
    %82 = vector.load %arg12[%c0_49, %c96] : memref<8x128xf32, #tpu.memory_space<vmem>>, vector<7x32xf32>
    tpu.vector_store %arg12[%c0_49, %c96], %81 {strides = array<i32>} : memref<8x128xf32, #tpu.memory_space<vmem>>, vector<7x32xf32>,
    %c0_50 = arith.constant 0 : index
    %c0_51 = arith.constant 0 : index
    %83 = vector.load %arg12[%c0_50, %c0_51] : memref<8x128xf32, #tpu.memory_space<vmem>>, vector<8x128xf32>
    %c0_52 = arith.constant 0 : index
    %c0_53 = arith.constant 0 : index
    %84 = vector.load %arg4[%c0_52, %c0_53] : memref<128x16xf32, #tpu.memory_space<vmem>>, vector<128x16xf32>
    %cst_54 = arith.constant dense<0.000000e+00> : vector<8x16xf32>
    %85 = tpu.matmul %83, %84, %cst_54 {dimension_numbers = #tpu.dot_dimension_numbers<[1], [0], [0], [1], [0, 0, 1, 1], [], []>, precision = #tpu.contract_precision<fp32>} : vector<8x128xf32>, vector<128x16xf32>, vector<8x16xf32> -> vector<8x16xf32>
    %c0_55 = arith.constant 0 : index
    %c0_56 = arith.constant 0 : index
    %86 = vector.load %arg5[%c0_55, %c0_56] : memref<1x16xf32, #tpu.memory_space<vmem>>, vector<1x16xf32>
    %87 = vector.broadcast %86 : vector<1x16xf32> to vector<8x16xf32>
    %88 = arith.addf %85, %87 : vector<8x16xf32>
    %c0_57 = arith.constant 0 : index
    %c0_58 = arith.constant 0 : index
    %89 = vector.load %arg6[%c0_57, %c0_58] : memref<16x64xf32, #tpu.memory_space<vmem>>, vector<16x64xf32>
    %cst_59 = arith.constant dense<0.000000e+00> : vector<8x64xf32>
    %90 = tpu.matmul %88, %89, %cst_59 {dimension_numbers = #tpu.dot_dimension_numbers<[1], [0], [0], [1], [0, 0, 1, 1], [], []>, precision = #tpu.contract_precision<fp32>} : vector<8x16xf32>, vector<16x64xf32>, vector<8x64xf32> -> vector<8x64xf32>
    %c0_60 = arith.constant 0 : index
    %c0_61 = arith.constant 0 : index
    %91 = vector.load %arg7[%c0_60, %c0_61] : memref<1x64xf32, #tpu.memory_space<vmem>>, vector<1x64xf32>
    %cst_62 = arith.constant 2.000000e+00 : f32
    %92 = vector.broadcast %cst_62 : f32 to vector<8x64xf32>
    %93 = arith.mulf %92, %90 : vector<8x64xf32>
    %94 = vector.broadcast %91 : vector<1x64xf32> to vector<8x64xf32>
    %95 = arith.subf %94, %93 : vector<8x64xf32>
    %cst_63 = arith.constant dense<0x7F800000> : vector<8xf32>
    %96 = vector.multi_reduction <minimumf>, %95, %cst_63 [1] : vector<8x64xf32> to vector<8xf32>
    %97 = vector.shape_cast %96 : vector<8xf32> to vector<8x1xf32>
    %98 = tpu.iota {dimensions = array<i32: 1>} : vector<8x64xi32>
    %99 = vector.broadcast %97 : vector<8x1xf32> to vector<8x64xf32>
    %100 = arith.cmpf ole, %95, %99 : vector<8x64xf32>
    %c64_i32 = arith.constant 64 : i32
    %101 = vector.broadcast %c64_i32 : i32 to vector<8x64xi32>
    %102 = arith.select %100, %98, %101 : vector<8x64xi1>, vector<8x64xi32>
    %cst_64 = arith.constant dense<2147483647> : vector<8xi32>
    %103 = vector.multi_reduction <minsi>, %102, %cst_64 [1] : vector<8x64xi32> to vector<8xi32>
    %104 = vector.shape_cast %103 : vector<8xi32> to vector<8x1xi32>
    %c0_65 = arith.constant 0 : index
    %c0_66 = arith.constant 0 : index
    %105 = vector.load %arg8[%c0_65, %c0_66] : memref<8x16xf32, #tpu.memory_space<vmem>>, vector<8x16xf32>
    tpu.vector_store %arg8[%c0_65, %c0_66], %88 {strides = array<i32>} : memref<8x16xf32, #tpu.memory_space<vmem>>, vector<8x16xf32>,
    %c0_67 = arith.constant 0 : index
    %c0_68 = arith.constant 0 : index
    %106 = vector.load %arg9[%c0_67, %c0_68] : memref<8x1xi32, #tpu.memory_space<vmem>>, vector<8x1xi32>
    tpu.vector_store %arg9[%c0_67, %c0_68], %104 {strides = array<i32>} : memref<8x1xi32, #tpu.memory_space<vmem>>, vector<8x1xi32>,
    return
  }
  func.func @transform_0(%arg0: i32) -> (i32, i32) {
    %c0_i32 = arith.constant 0 : i32
    %c0_i32_0 = arith.constant 0 : i32
    return %arg0, %c0_i32 : i32, i32
  }
  func.func @transform_1(%arg0: i32) -> (i32, i32) {
    %c0_i32 = arith.constant 0 : i32
    %c0_i32_0 = arith.constant 0 : i32
    %c0_i32_1 = arith.constant 0 : i32
    return %c0_i32, %c0_i32_0 : i32, i32
  }
  func.func @transform_2(%arg0: i32) -> (i32, i32) {
    %c0_i32 = arith.constant 0 : i32
    %c0_i32_0 = arith.constant 0 : i32
    %c0_i32_1 = arith.constant 0 : i32
    return %c0_i32, %c0_i32_0 : i32, i32
  }
  func.func @transform_3(%arg0: i32) -> (i32, i32) {
    %c0_i32 = arith.constant 0 : i32
    %c0_i32_0 = arith.constant 0 : i32
    %c0_i32_1 = arith.constant 0 : i32
    return %c0_i32, %c0_i32_0 : i32, i32
  }
  func.func @transform_4(%arg0: i32) -> (i32, i32) {
    %c0_i32 = arith.constant 0 : i32
    %c0_i32_0 = arith.constant 0 : i32
    %c0_i32_1 = arith.constant 0 : i32
    return %c0_i32, %c0_i32_0 : i32, i32
  }
  func.func @transform_5(%arg0: i32) -> (i32, i32) {
    %c0_i32 = arith.constant 0 : i32
    %c0_i32_0 = arith.constant 0 : i32
    %c0_i32_1 = arith.constant 0 : i32
    return %c0_i32, %c0_i32_0 : i32, i32
  }
  func.func @transform_6(%arg0: i32) -> (i32, i32) {
    %c0_i32 = arith.constant 0 : i32
    %c0_i32_0 = arith.constant 0 : i32
    %c0_i32_1 = arith.constant 0 : i32
    return %c0_i32, %c0_i32_0 : i32, i32
  }
  func.func @transform_7(%arg0: i32) -> (i32, i32) {
    %c0_i32 = arith.constant 0 : i32
    %c0_i32_0 = arith.constant 0 : i32
    return %arg0, %c0_i32 : i32, i32
  }
  func.func @transform_8(%arg0: i32) -> (i32, i32) {
    %c0_i32 = arith.constant 0 : i32
    %c0_i32_0 = arith.constant 0 : i32
    return %arg0, %c0_i32 : i32, i32
  }
}

</mosaic_0001>

<bundles_post_ra>
// kernel: vqvae_encoder_forward.1
= control target key start
LH: loop header
LB: loop body
LE: loop exit
PB: predicated region body
PF: predicated region fallthrough
CT: control target
= control target key end

     0   :  { %v61_v2 = vlaneseq  ;;  %s995_s9 = smov 4   ;;  %s996_s10 = smov 8   ;;  %s1385_s0 = inlined_call_operand.vmem [shape: f32[32,4], index: 0, kind: input, shape index: {}]   ;;  %s1386_s1 = inlined_call_operand.vmem [shape: f32[16,32], index: 1, kind: input, shape index: {}]   ;;  %s1387_s2 = inlined_call_operand.vmem [shape: f32[1,32], index: 2, kind: input, shape index: {}]   ;;  %s1388_s3 = inlined_call_operand.vmem [shape: f32[128,16], index: 3, kind: input, shape index: {}]   ;;  %s1389_s4 = inlined_call_operand.vmem [shape: f32[1,16], index: 4, kind: input, shape index: {}]   ;;  %s1390_s5 = inlined_call_operand.vmem [shape: f32[16,64], index: 5, kind: input, shape index: {}]   ;;  %s1391_s6 = inlined_call_operand.vmem [shape: f32[1,64], index: 6, kind: input, shape index: {}]   ;;  %s1392_s7 = inlined_call_operand.hbm [shape: f32[8,16], index: 7, kind: output, shape index: {0}]   ;;  %s1393_s8 = inlined_call_operand.vmem [shape: s32[8,1], index: 8, kind: output, shape index: {1}]  }
   0x1   :  { %v32_v0 = vld [vmem:[%s1385_s0] ss:$2 sm:$0xff]  ;;  %v952_v1 = vld [vmem:[%s1385_s0 + $0x1] ss:$2 sm:$0xff] }
   0x2   :  { %37 = vrot.lane.b32.xlu0 %v32_v0, %s995_s9  ;;  %52 = vrot.lane.b32.xlu1 %v952_v1, %s996_s10  ;;  %v1055_v3 = vshrl.u32 %v61_v2, 7  ;;  %v956_v4 = vld [vmem:[%s1385_s0 + $0x2] ss:$2 sm:$0xff] }
   0x4   :  { %v68_v5 = vand.u32 7, %v1055_v3  ;;  %v63_v6 = vadd.s32 8, %v1055_v3 }
   0x5   :  { %14 = vsyncpa [#allocation6], 0  ;;  %v951_v7 = vld [vmem:[%s1385_s0 + $0x10] ss:$2 sm:$0xff]  ;;  %v953_v8 = vld [vmem:[%s1385_s0 + $0x11] ss:$2 sm:$0xff] }
   0x6   :  { %vm1068_vm0 = vcmp.eq.s32.totalorder %v68_v5, 7  ;;  %v75_v10 = vand.u32 7, %v63_v6  ;;  %s997_s17 = smov 12   ;;  %v957_v13 = vld [vmem:[%s1385_s0 + $0x12] ss:$2 sm:$0x7f] }
   0x7   :  { %v106_v11 = vsel %vm1068_vm0, 0.0, %v956_v4  ;;  %vm29_vm2 = vcmask 130048   ;;  %v998_v15 = vmov 0.0   ;;  %v123_v16 = vld [vmem:[%s1386_s1 + $0x8] sm:$0xff]  ;;  %v122_v18 = vld [vmem:[%s1386_s1] sm:$0xff]  ;;  %vm43_vm3 = vcmask 64544  }
   0x8   :  { %110 = vrot.lane.b32.xlu2 %v106_v11, %s997_s17  ;;  %vm1074_vm1 = vcmp.eq.s32.totalorder %v75_v10, 7  ;;  %30 = vst.msk [vmem:[#allocation2] sm:$0xff] %vm29_vm2, %v998_v15  ;;  %v148_v17 = vand.u32 4294901760, %v123_v16  ;;  %v150_v20 = vand.u32 4294901760, %v122_v18  ;;  %vm58_vm4 = vcmask 97344   ;;  %v389_v60 = vld [vmem:[%s1388_s3 + $0x78] sm:$0xff] }
   0x9   :  { %v107_v14 = vsel %vm1074_vm1, 0.0, %v957_v13  ;;  %31 = vst.msk [vmem:[#allocation2 + $0x8] sm:$0xff] %vm29_vm2, %v998_v15  ;;  %v954_v31 = vld [vmem:[%s1385_s0 + $0x1] ss:$2 sm:$0xff]  ;;  %vm98_vm5 = vcmask 31744   ;;  %vm100_vm6 = vcmask 30720  }
   0xa   :  { %39 = vrot.lane.b32.xlu0 %v951_v7, %s995_s9  ;;  %54 = vrot.lane.b32.xlu1 %v953_v8, %s996_s10  ;;  %329 = vst [vmem:[#allocation4] sm:$0xff] %v998_v15  ;;  %v184_v19 = vsub.f32 %v123_v16, %v148_v17  ;;  %v190_v22 = vsub.f32 %v122_v18, %v150_v20  ;;  %v955_v32 = vld [vmem:[%s1385_s0 + $0x11] ss:$2 sm:$0x7f]  ;;  %v96_v33 = vsel %vm1068_vm0, 0.0, %v954_v31  ;;  %vm116_vm7 = vcmask 130144  }
   0xb   :  { %250 = vmatpush.msra.mxu3 %v148_v17  ;;  %149 = vmatpush.msra.mxu0 %v148_v17  ;;  %v97_v36 = vsel %vm1074_vm1, 0.0, %v955_v32  ;;  %vm118_vm8 = vcmask 129120   ;;  %v966_v53 = vld [vmem:[%s1387_s2] ss:$0 sm:$0xff]  ;;  %v388_v61 = vld [vmem:[%s1388_s3 + $0x70] sm:$0xff]  ;;  %v387_v62 = vld [vmem:[%s1388_s3 + $0x68] sm:$0xff] }
   0xc   :  { %v185_v21 = vand.u32 4294901760, %v184_v19  ;;  %220 = vmatpush.msra.mxu2 %v184_v19  ;;  %v191_v24 = vand.u32 4294901760, %v190_v22  ;;  %v1117_v0 = vand.u32 4294901760, %v389_v60  ;;  %v1119_v1 = vand.u32 4294901760, %v388_v61  ;;  %v386_v5 = vld [vmem:[%s1388_s3 + $0x60] sm:$0xff]  ;;  %v385_v6 = vld [vmem:[%s1388_s3 + $0x58] sm:$0xff] }
   0xd   :  { %252 = vmatpush.msra.mxu3 %v150_v20  ;;  %151 = vmatpush.msra.mxu0 %v150_v20  ;;  %v1121_v4 = vand.u32 4294901760, %v387_v62  ;;  %v384_v7 = vld [vmem:[%s1388_s3 + $0x50] sm:$0xff]  ;;  %v1132_v9 = vand.u32 4294901760, %v386_v5  ;;  %v1134_v10 = vand.u32 4294901760, %v385_v6  ;;  %v383_v12 = vld [vmem:[%s1388_s3 + $0x48] sm:$0xff]  ;;  %vm326_vm9 = vcmask 261120  }
   0xe   :  { %v186_v23 = vsub.f32 %v184_v19, %v185_v21  ;;  %223 = vmatpush.msra.mxu2 %v190_v22  ;;  %v192_v26 = vsub.f32 %v190_v22, %v191_v24  ;;  %v1136_v11 = vand.u32 4294901760, %v384_v7  ;;  %v1145_v15 = vsub.f32 %v388_v61, %v1119_v1  ;;  %s999_s23 = smov 64   ;;  %s1000_s1 = smov 32  }
   0xf   :  { %283 = vmatpush.msrb.mxu0 %v185_v21  ;;  %v1148_v16 = vsub.f32 %v387_v62, %v1121_v4  ;;  %v1155_v18 = vsub.f32 %v386_v5, %v1132_v9  ;;  %v1158_v19 = vsub.f32 %v385_v6, %v1134_v10  ;;  %s1001_s24 = smov 96   ;;  %vm335_vm11 = vcmask 523520   ;;  %s1002_s20 = smov [#allocation5]  }
  0x10   :  { %112 = vrot.lane.b32.xlu2 %v107_v14, %s997_s17  ;;  %v187_v25 = vand.u32 4294901760, %v186_v23  ;;  %v193_v27 = vand.u32 4294901760, %v192_v26  ;;  %v1142_v14 = vsub.f32 %v389_v60, %v1117_v0  ;;  %395 = vmatpush.msrb.mxu2 %v1117_v0  ;;  %v443_v21 = vand.u32 4294901760, %v1145_v15  ;;  %s936_s21 = sshll.u32 %s1002_s20, 4  ;;  %s937_s21 = int_to_ptr.vmem [resolvable:$true] %s936_s21 }
  0x11   :  { %287 = vmatpush.msrb.mxu0 %v191_v24  ;;  %v449_v22 = vand.u32 4294901760, %v1148_v16  ;;  %v1165_v23 = vsub.f32 %v384_v7, %v1136_v11  ;;  %v455_v26 = vand.u32 4294901760, %v1155_v18  ;;  %vm343_vm12 = vcmask 785920  }
  0x12   :  { %188 = vmatpush.msra.mxu1 %v187_v25  ;;  %397 = vmatpush.msrb.mxu2 %v1119_v1  ;;  %v444_v31 = vsub.f32 %v1145_v15, %v443_v21  ;;  %vm362_vm13 = vcmask 260096   ;;  %vm371_vm14 = vcmask 1047296   ;;  %vm905_vm15 = vcmask 523264  }
  0x13   :  { %v450_v32 = vsub.f32 %v1148_v16, %v449_v22 }
  0x14   :  { %194 = vmatpush.msra.mxu1 %v193_v27  ;;  %399 = vmatpush.msrb.mxu2 %v1121_v4 }
  0x16   :  { %312 = vmatpush.msrb.mxu1 %v148_v17  ;;  %v1151_v17 = vand.u32 4294901760, %v383_v12  ;;  %401 = vmatpush.msrb.mxu2 %v1132_v9 }
  0x18   :  { %314 = vmatpush.msrb.mxu1 %v150_v20  ;;  %v437_v20 = vand.u32 4294901760, %v1142_v14  ;;  %v1170_v27 = vsub.f32 %v383_v12, %v1151_v17  ;;  %403 = vmatpush.msrb.mxu2 %v1134_v10 }
  0x1a   :  { %405 = vmatpush.msrb.mxu2 %v1136_v11 }
  0x1c   :  { %407 = vmatpush.msrb.mxu2 %v1151_v17 }
  0x62   :  { %v111_v30 = vpop.permute.xlu2 %110 }
  0x6a   :  { %v113_v37 = vpop.permute.xlu2 %112 }
  0x74   :  { %v38_v28 = vpop.permute.xlu0 %37  ;;  %v53_v29 = vpop.permute.xlu1 %52 }
  0x75   :  { %44 = vst.msk [vmem:[#allocation2] sm:$0xff] %vm43_vm3, %v38_v28 }
  0x76   :  { %59 = vst.msk [vmem:[#allocation2] sm:$0xff] %vm58_vm4, %v53_v29 }
  0x7c   :  { %v40_v34 = vpop.permute.xlu0 %39  ;;  %v55_v35 = vpop.permute.xlu1 %54 }
  0x7d   :  { %45 = vst.msk [vmem:[#allocation2 + $0x8] sm:$0xff] %vm43_vm3, %v40_v34 }
  0x7e   :  { %60 = vst.msk [vmem:[#allocation2 + $0x8] sm:$0xff] %vm58_vm4, %v55_v35  ;;  %v382_v35 = vld [vmem:[%s1388_s3 + $0x40] sm:$0xff] }
  0x7f   :  { %99 = vst.msk [vmem:[#allocation2 + $0x1] sm:$0xff] %vm98_vm5, %v96_v33  ;;  %v461_v33 = vand.u32 4294901760, %v1158_v19 }
  0x80   :  { %101 = vst.msk [vmem:[#allocation2 + $0x9] sm:$0x7f] %vm100_vm6, %v97_v36  ;;  %v381_v36 = vld [vmem:[%s1388_s3 + $0x38] sm:$0xff] }
  0x81   :  { %117 = vst.msk [vmem:[#allocation2] sm:$0xff] %vm116_vm7, %v111_v30  ;;  %v438_v30 = vsub.f32 %v1142_v14, %v437_v20 }
  0x82   :  { %119 = vst.msk [vmem:[#allocation2 + $0x8] sm:$0x7f] %vm118_vm8, %v113_v37 }
  0x88   :  { %v120_v38 = vld [vmem:[#allocation2] sm:$0xff] }
  0x89   :  { %v129_v39 = vsel %vm29_vm2, %v120_v38, 0  ;;  %v121_v40 = vld [vmem:[#allocation2 + $0x8] sm:$0xff]  ;;  %v439_v38 = vand.u32 4294901760, %v438_v30 }
  0x8a   :  { %v152_v41 = vand.u32 4294901760, %v129_v39  ;;  %v132_v42 = vsel %vm29_vm2, %v121_v40, 0  ;;  %v456_v40 = vsub.f32 %v1155_v18, %v455_v26 }
  0x8b   :  { %v160_v43 = vand.u32 4294901760, %v132_v42  ;;  %440 = vmatpush.msrb.mxu3 %v439_v38  ;;  %v378_v38 = vld [vmem:[%s1388_s3 + $0x20] sm:$0xff] }
  0x8c   :  { %196 = vmatmul.f32.vlgmr.msra.gmra.mxu1 %v152_v41  ;;  %v153_v44 = vsub.f32 %v129_v39, %v152_v41  ;;  %v445_v39 = vand.u32 4294901760, %v444_v31 }
  0x8d   :  { %v161_v46 = vsub.f32 %v132_v42, %v160_v43  ;;  %591 = vmatpush.msra.mxu1 %v1117_v0 }
  0x8e   :  { %226 = vmatmul.f32.vlgmr.msra.gmra.mxu2 %v153_v44  ;;  %v154_v45 = vand.u32 4294901760, %v153_v44  ;;  %446 = vmatpush.msrb.mxu3 %v445_v39 }
  0x8f   :  { %v162_v49 = vand.u32 4294901760, %v161_v46  ;;  %593 = vmatpush.msra.mxu1 %v1119_v1 }
  0x90   :  { %256 = vmatmul.f32.vlgmr.msra.gmra.mxu3 %v154_v45  ;;  %v155_v47 = vsub.f32 %v153_v44, %v154_v45  ;;  %v473_v44 = vand.u32 4294901760, %v1170_v27  ;;  %v451_v45 = vand.u32 4294901760, %v450_v32 }
  0x91   :  { %v163_v50 = vsub.f32 %v161_v46, %v162_v49  ;;  %595 = vmatpush.msra.mxu1 %v1121_v4 }
  0x92   :  { %v156_v48 = vand.u32 4294901760, %v155_v47  ;;  %v1203_v47 = vand.u32 4294901760, %v382_v35  ;;  %452 = vmatpush.msrb.mxu3 %v451_v45 }
  0x93   :  { %v164_v51 = vand.u32 4294901760, %v163_v50  ;;  %597 = vmatpush.msra.mxu1 %v1132_v9 }
  0x94   :  { %157 = vmatmul.f32.vlgmr.msra.gmra.mxu0 %v156_v48  ;;  %200 = vmatmul.f32.gmra.mxu1 %v160_v43  ;;  %v1206_v48 = vand.u32 4294901760, %v381_v36 }
  0x95   :  { %538 = vmatpush.msra.mxu0 %v1142_v14  ;;  %599 = vmatpush.msra.mxu1 %v1134_v10 }
  0x96   :  { %231 = vmatmul.f32.gmra.mxu2 %v161_v46  ;;  %v462_v46 = vsub.f32 %v1158_v19, %v461_v33 }
  0x97   :  { %541 = vmatpush.msra.mxu0 %v1145_v15  ;;  %601 = vmatpush.msra.mxu1 %v1136_v11 }
  0x98   :  { %262 = vmatmul.f32.gmra.mxu3 %v162_v49  ;;  %409 = vmatpush.msrb.mxu2 %v1203_v47 }
  0x99   :  { %544 = vmatpush.msra.mxu0 %v1148_v16  ;;  %603 = vmatpush.msra.mxu1 %v1151_v17 }
  0x9a   :  { %411 = vmatpush.msrb.mxu2 %v1206_v48 }
  0x9b   :  { %547 = vmatpush.msra.mxu0 %v1155_v18  ;;  %605 = vmatpush.msra.mxu1 %v1203_v47 }
  0x9c   :  { %165 = vmatmul.f32.gmra.mxu0 %v164_v51  ;;  %316 = vmatmul.f32.vlgmr.msrb.gmra.mxu1 %v152_v41  ;;  %v457_v51 = vand.u32 4294901760, %v456_v40 }
  0x9d   :  { %550 = vmatpush.msra.mxu0 %v1158_v19  ;;  %607 = vmatpush.msra.mxu1 %v1206_v48  ;;  %v736_v19 = vld [vmem:[%s1390_s5 + $0x8] sm:$0xff] }
  0x9e   :  { %458 = vmatpush.msrb.mxu3 %v457_v51  ;;  %v376_v51 = vld [vmem:[%s1388_s3 + $0x10] sm:$0xff] }
  0x9f   :  { %553 = vmatpush.msra.mxu0 %v1165_v23 }
  0xa1   :  { %556 = vmatpush.msra.mxu0 %v1170_v27 }
  0xa4   :  { %289 = vmatmul.f32.vlgmr.msrb.gmra.mxu0 %v152_v41  ;;  %320 = vmatmul.f32.gmra.mxu1 %v160_v43  ;;  %v467_v41 = vand.u32 4294901760, %v1165_v23 }
  0xac   :  { %293 = vmatmul.f32.gmra.mxu0 %v160_v43 }
 0x109   :  { %v197_v52 = vpop.f32.mrf.mxu1 }
 0x111   :  { %v158_v54 = vpop.f32.mrf.mxu0  ;;  %v201_v56 = vpop.f32.mrf.mxu1 }
 0x112   :  { %v159_v55 = vadd.f32 %v966_v53, %v158_v54  ;;  %v227_v58 = vpop.f32.mrf.mxu2  ;;  %v1217_v54 = vsub.f32 %v381_v36, %v1206_v48 }
 0x113   :  { %v257_v13 = vpop.f32.mrf.mxu3 }
 0x114   :  { %v198_v57 = vadd.f32 %v197_v52, %v159_v55  ;;  %v468_v52 = vsub.f32 %v1165_v23, %v467_v41  ;;  %v485_v60 = vand.u32 4294901760, %v1217_v54 }
 0x116   :  { %v228_v63 = vadd.f32 %v227_v58, %v198_v57  ;;  %v463_v57 = vand.u32 4294901760, %v462_v46  ;;  %v474_v58 = vsub.f32 %v1170_v27, %v473_v44 }
 0x118   :  { %v258_v24 = vadd.f32 %v257_v13, %v228_v63  ;;  %v469_v63 = vand.u32 4294901760, %v468_v52  ;;  %464 = vmatpush.msrb.mxu3 %v463_v57  ;;  %v475_v7 = vand.u32 4294901760, %v474_v58  ;;  %v1306_v58 = vand.u32 4294901760, %v376_v51 }
 0x119   :  { %v166_v59 = vpop.f32.mrf.mxu0  ;;  %v317_v28 = vpop.f32.mrf.mxu1 }
 0x11a   :  { %v167_v8 = vadd.f32 %v966_v53, %v166_v59  ;;  %v232_v37 = vpop.f32.mrf.mxu2  ;;  %v1214_v53 = vsub.f32 %v382_v35, %v1203_v47  ;;  %470 = vmatpush.msrb.mxu3 %v469_v63  ;;  %v379_v35 = vld [vmem:[%s1388_s3 + $0x28] sm:$0xff] }
 0x11b   :  { %v263_v50 = vpop.f32.mrf.mxu3 }
 0x11c   :  { %v202_v25 = vadd.f32 %v201_v56, %v167_v8  ;;  %v479_v59 = vand.u32 4294901760, %v1214_v53  ;;  %v486_v8 = vsub.f32 %v1217_v54, %v485_v60  ;;  %559 = vmatpush.msra.mxu0 %v1214_v53  ;;  %476 = vmatpush.msrb.mxu3 %v475_v7 }
 0x11e   :  { %v233_v42 = vadd.f32 %v232_v37, %v202_v25  ;;  %v480_v5 = vsub.f32 %v1214_v53, %v479_v59  ;;  %562 = vmatpush.msra.mxu0 %v1217_v54  ;;  %v349_v25 = vand.u32 3, %v1055_v3  ;;  %v380_v3 = vld [vmem:[%s1388_s3 + $0x30] sm:$0xff]  ;;  %v1263_v37 = vand.u32 4294901760, %v379_v35  ;;  %v967_v53 = vld [vmem:[%s1389_s4] ss:$0 sm:$0xff] }
 0x120   :  { %v264_v55 = vadd.f32 %v263_v50, %v233_v42  ;;  %v481_v13 = vand.u32 4294901760, %v480_v5  ;;  %vm1246_vm10 = vcmp.eq.s32.totalorder %v349_v25, 3  ;;  %v1272_v40 = vsub.f32 %v379_v35, %v1263_v37 }
 0x121   :  { %v290_v29 = vpop.f32.mrf.mxu0  ;;  %v321_v62 = vpop.f32.mrf.mxu1  ;;  %v1274_v42 = vand.u32 4294901760, %v378_v38 }
 0x122   :  { %v291_v34 = vadd.f32 %v290_v29, %v258_v24  ;;  %v487_v24 = vand.u32 4294901760, %v486_v8  ;;  %482 = vmatpush.msrb.mxu3 %v481_v13  ;;  %v497_v46 = vand.u32 4294901760, %v1272_v40  ;;  %v514_v8 = vsub.f32 %v376_v51, %v1306_v58 }
 0x124   :  { %v318_v43 = vadd.f32 %v317_v28, %v291_v34  ;;  %488 = vmatpush.msrb.mxu3 %v487_v24  ;;  %v1255_v34 = vand.u32 4294901760, %v380_v3 }
 0x126   :  { %v324_v49 = vmax.f32 %v318_v43, 0.0  ;;  %v1261_v36 = vsub.f32 %v380_v3, %v1255_v34  ;;  %413 = vmatpush.msrb.mxu2 %v1255_v34  ;;  %609 = vmatpush.msra.mxu1 %v1255_v34  ;;  %v377_v43 = vld [vmem:[%s1388_s3 + $0x18] sm:$0xff] }
 0x127   :  { %v1289_v50 = vand.u32 4294901760, %v377_v43 }
 0x128   :  { %327 = vst.msk [vmem:[#allocation3] sm:$0xff] %vm326_vm9, %v324_v49  ;;  %v491_v39 = vand.u32 4294901760, %v1261_v36  ;;  %415 = vmatpush.msrb.mxu2 %v1263_v37  ;;  %565 = vmatpush.msra.mxu0 %v1261_v36  ;;  %v1287_v49 = vsub.f32 %v378_v38, %v1274_v42 }
 0x129   :  { %v294_v56 = vpop.f32.mrf.mxu0  ;;  %611 = vmatpush.msra.mxu1 %v1263_v37  ;;  %v1302_v57 = vsub.f32 %v377_v43, %v1289_v50 }
 0x12a   :  { %v295_v61 = vadd.f32 %v294_v56, %v264_v55  ;;  %v492_v45 = vsub.f32 %v1261_v36, %v491_v39  ;;  %417 = vmatpush.msrb.mxu2 %v1274_v42  ;;  %568 = vmatpush.msra.mxu0 %v1272_v40  ;;  %v498_v55 = vsub.f32 %v1272_v40, %v497_v46  ;;  %v503_v56 = vand.u32 4294901760, %v1287_v49 }
 0x12b   :  { %613 = vmatpush.msra.mxu1 %v1274_v42 }
 0x12c   :  { %v322_v6 = vadd.f32 %v321_v62, %v295_v61  ;;  %v493_v52 = vand.u32 4294901760, %v492_v45  ;;  %419 = vmatpush.msrb.mxu2 %v1289_v50  ;;  %571 = vmatpush.msra.mxu0 %v1287_v49  ;;  %v375_v61 = vld [vmem:[%s1388_s3 + $0x8] sm:$0xff]  ;;  %v374_v62 = vld [vmem:[%s1388_s3] sm:$0xff]  ;;  %v499_v63 = vand.u32 4294901760, %v498_v55  ;;  %v504_v5 = vsub.f32 %v1287_v49, %v503_v56 }
 0x12d   :  { %615 = vmatpush.msra.mxu1 %v1289_v50  ;;  %v422_v7 = vand.u32 4294901760, %v375_v61 }
 0x12e   :  { %v325_v12 = vmax.f32 %v322_v6, 0.0  ;;  %494 = vmatpush.msrb.mxu3 %v493_v52  ;;  %v509_v6 = vand.u32 4294901760, %v1302_v57  ;;  %574 = vmatpush.msra.mxu0 %v1302_v57  ;;  %v505_v13 = vand.u32 4294901760, %v504_v5 }
 0x12f   :  { %421 = vmatpush.msrb.mxu2 %v1306_v58  ;;  %617 = vmatpush.msra.mxu1 %v1306_v58  ;;  %v520_v25 = vsub.f32 %v375_v61, %v422_v7 }
 0x130   :  { %328 = vst.msk [vmem:[#allocation3 + $0x8] sm:$0xff] %vm326_vm9, %v325_v12  ;;  %v424_v12 = vand.u32 4294901760, %v374_v62  ;;  %500 = vmatpush.msrb.mxu3 %v499_v63  ;;  %v510_v24 = vsub.f32 %v1302_v57, %v509_v6  ;;  %577 = vmatpush.msra.mxu0 %v514_v8 }
 0x131   :  { %423 = vmatpush.msrb.mxu2 %v422_v7  ;;  %619 = vmatpush.msra.mxu1 %v422_v7 }
 0x132   :  { %506 = vmatpush.msrb.mxu3 %v505_v13  ;;  %580 = vmatpush.msra.mxu0 %v520_v25 }
 0x133   :  { %425 = vmatpush.msrb.mxu2 %v424_v12  ;;  %621 = vmatpush.msra.mxu1 %v424_v12 }
 0x135   :  { %632 = vmatpush.msra.mxu2 %v437_v20  ;;  %v754_v20 = vand.u32 4294901760, %v736_v19 }
 0x137   :  { %v338_v29 = vld [vmem:[#allocation3 + $0x1] ss:$2 sm:$0xff]  ;;  %v330_v30 = vld [vmem:[#allocation3] ss:$2 sm:$0xff]  ;;  %636 = vmatpush.msra.mxu2 %v443_v21  ;;  %v735_v21 = vld [vmem:[%s1390_s5] sm:$0xff] }
 0x138   :  { %340 = vrot.lane.b32.xlu1 %v338_v29, %s999_s23  ;;  %332 = vrot.lane.b32.xlu0 %v330_v30, %s1000_s1  ;;  %v365_v31 = vld [vmem:[#allocation3 + $0x2] ss:$2 sm:$0x7f]  ;;  %v515_v29 = vand.u32 4294901760, %v514_v8  ;;  %v526_v30 = vsub.f32 %v374_v62, %v424_v12  ;;  %v756_v23 = vand.u32 4294901760, %v735_v21 }
 0x139   :  { %v366_v32 = vsel %vm1246_vm10, 0.0, %v365_v31  ;;  %v511_v31 = vand.u32 4294901760, %v510_v24  ;;  %640 = vmatpush.msra.mxu2 %v449_v22  ;;  %v782_v22 = vsub.f32 %v736_v19, %v754_v20 }
 0x13a   :  { %368 = vrot.lane.b32.xlu2 %v366_v32, %s1001_s24  ;;  %v521_v32 = vand.u32 4294901760, %v520_v25  ;;  %v516_v3 = vsub.f32 %v514_v8, %v515_v29  ;;  %v527_v35 = vand.u32 4294901760, %v526_v30  ;;  %583 = vmatpush.msra.mxu0 %v526_v30  ;;  %v788_v27 = vsub.f32 %v735_v21, %v756_v23 }
 0x13b   :  { %512 = vmatpush.msrb.mxu3 %v511_v31  ;;  %644 = vmatpush.msra.mxu2 %v455_v26  ;;  %v783_v26 = vand.u32 4294901760, %v782_v22 }
 0x13c   :  { %v522_v38 = vsub.f32 %v520_v25, %v521_v32  ;;  %v517_v43 = vand.u32 4294901760, %v516_v3  ;;  %v528_v45 = vsub.f32 %v526_v30, %v527_v35  ;;  %755 = vmatpush.msrb.mxu0 %v754_v20  ;;  %v968_v30 = vld [vmem:[%s1391_s6] ss:$0 sm:$0xff]  ;;  %s938_s6 = sshll.u32 %s1392_s7, 4  ;;  %s939_s6 = int_to_ptr.hbm [resolvable:$true] %s938_s6 }
 0x13d   :  { %648 = vmatpush.msra.mxu2 %v461_v33  ;;  %v784_v33 = vsub.f32 %v782_v22, %v783_v26 }
 0x13e   :  { %v523_v51 = vand.u32 4294901760, %v522_v38  ;;  %518 = vmatpush.msrb.mxu3 %v517_v43  ;;  %v529_v52 = vand.u32 4294901760, %v528_v45  ;;  %757 = vmatpush.msrb.mxu0 %v756_v23 }
 0x13f   :  { %652 = vmatpush.msra.mxu2 %v467_v41  ;;  %v789_v41 = vand.u32 4294901760, %v788_v27 }
 0x140   :  { %524 = vmatpush.msrb.mxu3 %v523_v51 }
 0x141   :  { %656 = vmatpush.msra.mxu2 %v473_v44  ;;  %v785_v44 = vand.u32 4294901760, %v784_v33 }
 0x142   :  { %530 = vmatpush.msrb.mxu3 %v529_v52 }
 0x143   :  { %660 = vmatpush.msra.mxu2 %v479_v59  ;;  %786 = vmatpush.msrb.mxu1 %v785_v44 }
 0x144   :  { %699 = vmatpush.msra.mxu3 %v1117_v0  ;;  %v358_v0 = vld [vmem:[#allocation3 + $0x1] ss:$2 sm:$0x7f] }
 0x145   :  { %664 = vmatpush.msra.mxu2 %v485_v60 }
 0x146   :  { %701 = vmatpush.msra.mxu3 %v1119_v1 }
 0x147   :  { %668 = vmatpush.msra.mxu2 %v491_v39 }
 0x148   :  { %703 = vmatpush.msra.mxu3 %v1121_v4 }
 0x149   :  { %672 = vmatpush.msra.mxu2 %v497_v46 }
 0x14a   :  { %705 = vmatpush.msra.mxu3 %v1132_v9  ;;  %v361_v9 = vsel %vm1246_vm10, 0.0, %v358_v0 }
 0x14b   :  { %676 = vmatpush.msra.mxu2 %v503_v56 }
 0x14c   :  { %707 = vmatpush.msra.mxu3 %v1134_v10 }
 0x14d   :  { %680 = vmatpush.msra.mxu2 %v509_v6 }
 0x14e   :  { %709 = vmatpush.msra.mxu3 %v1136_v11 }
 0x14f   :  { %684 = vmatpush.msra.mxu2 %v515_v29 }
 0x150   :  { %711 = vmatpush.msra.mxu3 %v1151_v17 }
 0x151   :  { %688 = vmatpush.msra.mxu2 %v521_v32 }
 0x152   :  { %713 = vmatpush.msra.mxu3 %v1203_v47  ;;  %v790_v47 = vsub.f32 %v788_v27, %v789_v41 }
 0x153   :  { %692 = vmatpush.msra.mxu2 %v527_v35  ;;  %v910_v35 = vand.u32 127, %v61_v2 }
 0x154   :  { %715 = vmatpush.msra.mxu3 %v1206_v48  ;;  %v791_v48 = vand.u32 4294901760, %v790_v47 }
 0x156   :  { %717 = vmatpush.msra.mxu3 %v1255_v34  ;;  %792 = vmatpush.msrb.mxu1 %v791_v48 }
 0x158   :  { %719 = vmatpush.msra.mxu3 %v1263_v37 }
 0x15a   :  { %721 = vmatpush.msra.mxu3 %v1274_v42 }
 0x15c   :  { %723 = vmatpush.msra.mxu3 %v1289_v50 }
 0x15e   :  { %725 = vmatpush.msra.mxu3 %v1306_v58 }
 0x160   :  { %727 = vmatpush.msra.mxu3 %v422_v7 }
 0x162   :  { %729 = vmatpush.msra.mxu3 %v424_v12 }
 0x194   :  { %v369_v10 = vpop.permute.xlu2 %368 }
 0x1aa   :  { %v341_v1 = vpop.permute.xlu1 %340  ;;  %v333_v4 = vpop.permute.xlu0 %332 }
 0x1ab   :  { %336 = vst.msk [vmem:[#allocation4] sm:$0xff] %vm335_vm11, %v333_v4 }
 0x1ac   :  { %344 = vst.msk [vmem:[#allocation4] sm:$0xff] %vm343_vm12, %v341_v1 }
 0x1ad   :  { %363 = vst.msk [vmem:[#allocation4 + $0x1] sm:$0x7f] %vm362_vm13, %v361_v9 }
 0x1ae   :  { %372 = vst.msk [vmem:[#allocation4] sm:$0x7f] %vm371_vm14, %v369_v10 }
 0x1b5   :  { %v373_v11 = vld [vmem:[#allocation4] sm:$0xff] }
 0x1b6   :  { %v426_v14 = vand.u32 4294901760, %v373_v11 }
 0x1b8   :  { %532 = vmatmul.f32.vlgmr.msrb.gmra.mxu3 %v426_v14  ;;  %v427_v15 = vsub.f32 %v373_v11, %v426_v14 }
 0x1ba   :  { %586 = vmatmul.f32.vlgmr.msra.gmra.mxu0 %v427_v15  ;;  %v428_v16 = vand.u32 4294901760, %v427_v15 }
 0x1bb   :  { %814 = vmatpush.msra.mxu0 %v782_v22 }
 0x1bc   :  { %625 = vmatmul.f32.vlgmr.msra.gmra.mxu1 %v428_v16  ;;  %v429_v17 = vsub.f32 %v427_v15, %v428_v16 }
 0x1bd   :  { %817 = vmatpush.msra.mxu0 %v788_v27  ;;  %839 = vmatpush.msra.mxu1 %v754_v20 }
 0x1be   :  { %v430_v18 = vand.u32 4294901760, %v429_v17 }
 0x1bf   :  { %841 = vmatpush.msra.mxu1 %v756_v23 }
 0x1c0   :  { %431 = vmatmul.f32.vlgmr.msrb.gmra.mxu2 %v430_v18  ;;  %731 = vmatmul.f32.vlgmr.msra.gmra.mxu3 %v426_v14 }
 0x1c8   :  { %694 = vmatmul.f32.vlgmr.msra.gmra.mxu2 %v426_v14 }
 0x237   :  { %v587_v34 = vpop.f32.mrf.mxu0 }
 0x239   :  { %v626_v37 = vpop.f32.mrf.mxu1 }
 0x23b   :  { %v533_v54 = vpop.f32.mrf.mxu3 }
 0x243   :  { %v432_v59 = vpop.f32.mrf.mxu2  ;;  %v732_v46 = vpop.f32.mrf.mxu3 }
 0x244   :  { %v433_v60 = vadd.f32 %v967_v53, %v432_v59 }
 0x246   :  { %v534_v28 = vadd.f32 %v533_v54, %v433_v60 }
 0x248   :  { %v588_v36 = vadd.f32 %v587_v34, %v534_v28 }
 0x24a   :  { %v627_v39 = vadd.f32 %v626_v37, %v588_v36 }
 0x24b   :  { %v695_v40 = vpop.f32.mrf.mxu2 }
 0x24c   :  { %v696_v42 = vadd.f32 %v695_v40, %v627_v39 }
 0x24e   :  { %v733_v49 = vadd.f32 %v732_v46, %v696_v42 }
 0x250   :  { %v738_v50 = vsel %vm29_vm2, %v733_v49, 0  ;;  %928 = vst.msk [vmem:[#allocation5] sm:$0xff] %vm29_vm2, %v733_v49  ;;  %vm929_vm2 = vcmask 7168  }
 0x251   :  { %v758_v55 = vand.u32 4294901760, %v738_v50  ;;  %941 = dma.vmem_to_hbm [thread:$0]  %s937_s21, 128, %s939_s6, [#allocation6]  }
 0x253   :  { %v759_v56 = vsub.f32 %v738_v50, %v758_v55  ;;  %794 = vmatmul.f32.vlgmr.msrb.gmra.mxu1 %v758_v55 }
 0x254   :  { %891 = vmatpush.msrb.mxu1 %v754_v20 }
 0x255   :  { %v760_v57 = vand.u32 4294901760, %v759_v56 }
 0x256   :  { %893 = vmatpush.msrb.mxu1 %v756_v23 }
 0x257   :  { %v761_v58 = vsub.f32 %v759_v56, %v760_v57 }
 0x259   :  { %v762_v61 = vand.u32 4294901760, %v761_v58 }
 0x25b   :  { %763 = vmatmul.f32.vlgmr.msrb.gmra.mxu0 %v762_v61  ;;  %845 = vmatmul.f32.vlgmr.msra.gmra.mxu1 %v760_v57 }
 0x25c   :  { %866 = vmatpush.msrb.mxu0 %v783_v26 }
 0x25e   :  { %870 = vmatpush.msrb.mxu0 %v789_v41 }
 0x263   :  { %820 = vmatmul.f32.vlgmr.msra.gmra.mxu0 %v759_v56  ;;  %895 = vmatmul.f32.vlgmr.msrb.gmra.mxu1 %v758_v55 }
 0x26b   :  { %872 = vmatmul.f32.vlgmr.msrb.gmra.mxu0 %v758_v55 }
 0x2d0   :  { %v795_v62 = vpop.f32.mrf.mxu1 }
 0x2d8   :  { %v764_v63 = vpop.f32.mrf.mxu0  ;;  %v846_v5 = vpop.f32.mrf.mxu1 }
 0x2d9   :  { %v796_v7 = vadd.f32 %v795_v62, %v764_v63 }
 0x2e0   :  { %v821_v6 = vpop.f32.mrf.mxu0  ;;  %v896_v25 = vpop.f32.mrf.mxu1 }
 0x2e1   :  { %v822_v8 = vadd.f32 %v821_v6, %v796_v7 }
 0x2e3   :  { %v847_v12 = vadd.f32 %v846_v5, %v822_v8 }
 0x2e8   :  { %v873_v13 = vpop.f32.mrf.mxu0 }
 0x2e9   :  { %v874_v24 = vadd.f32 %v873_v13, %v847_v12 }
 0x2eb   :  { %v897_v29 = vadd.f32 %v896_v25, %v874_v24 }
 0x2ed   :  { %v900_v31 = vmul.f32 2.0, %v897_v29 }
 0x2ef   :  { %v904_v32 = vsub.f32 %v968_v30, %v900_v31 }
 0x2f1   :  { %v906_v3 = vsel %vm905_vm15, %v904_v32, inf }
 0x2f2   :  { %907 = vmin.xlane.f32.xlu0 %v906_v3 }
 0x365   :  { %v908_v38 = vpop.xlane.xlu0 %907 }
 0x366   :  { %vm911_vm0 = vcmp.le.f32.partialorder %v904_v32, %v908_v38 }
 0x367   :  { %v912_v43 = vsel %vm911_vm0, %v910_v35, 64 }
 0x368   :  { %v913_v45 = vsel %vm905_vm15, %v912_v43, 2147483647 }
 0x369   :  { %v915_v51 = vshra.s32 %v913_v45, 16  ;;  %v914_v0 = vand.u32 65535, %v913_v45 }
 0x36b   :  { %v917_v52 = vcvt.s32.f32 %v915_v51  ;;  %v916_v4 = vcvt.s32.f32 %v914_v0 }
 0x36d   :  { %918 = vmin.xlane.f32.xlu1 %v917_v52 }
 0x3e0   :  { %v919_v1 = vpop.xlane.xlu1 %918 }
 0x3e1   :  { %vm920_vm1 = vcmp.eq.f32.partialorder %v917_v52, %v919_v1  ;;  %v925_v9 = vcvt.f32.s32 %v919_v1 }
 0x3e2   :  { %v921_v2 = vsel %vm920_vm1, %v916_v4, inf }
 0x3e3   :  { %922 = vmin.xlane.f32.xlu2 %v921_v2  ;;  %v926_v11 = vshll.u32 %v925_v9, 16 }
 0x456   :  { %v923_v10 = vpop.xlane.xlu2 %922 }
 0x457   :  { %v924_v14 = vcvt.f32.s32 %v923_v10 }
 0x459   :  { %v927_v15 = vadd.s32 %v926_v11, %v924_v14 }
 0x45b   :  { %930 = vst.msk [vmem:[%s1393_s8] sm:$0xff] %vm929_vm2, %v927_v15 }
 0x45c   :  { %993 = dma.done.wait [#allocation6], 128  }
 0x45d   :  { %994 = vsyncadd [#allocation6], 4294967168 }
 0x45e   :  { %950 = vsyncpa [#allocation6], 1 }

</bundles_post_ra>
